<compile_context>
chip_gen: v6e
topology: v6e:2x2x1
jax: 0.10.0
libtpu: 0.0.40
codegen_flags: <defaults>
</compile_context>

<pallas_src>
import jax
import jax.numpy as jnp
from jax.experimental import pallas as pl
from jax.experimental.pallas import tpu as pltpu


def _layernorm(x, gamma, beta, eps=1e-5):
    # PyTorch nn.LayerNorm: biased variance over the last dim, eps inside rsqrt.
    mu = jnp.mean(x, axis=-1, keepdims=True)
    var = jnp.mean(jnp.square(x - mu), axis=-1, keepdims=True)
    return (x - mu) * jax.lax.rsqrt(var + eps) * gamma + beta


def _silu(x):
    return x * jax.nn.sigmoid(x)


def _batched_adj_matmul(adj_bf16, v, B, N):
    """Per-batch  adj @ v[b]  for v laid out as (B*N, C); returns (B*N, C) f32.

    B is tiny and static, so a static unrolled loop of small MXU matmuls is
    cheaper than an einsum that would need an XLU transpose of the result.
    """
    vb = v.astype(jnp.bfloat16)
    parts = [
        jnp.dot(adj_bf16, vb[b * N:(b + 1) * N, :],
                preferred_element_type=jnp.float32)
        for b in range(B)
    ]
    return parts[0] if B == 1 else jnp.concatenate(parts, axis=0)


def _make_kernel(B, N, agg_first_conv1, has_skip_proj):
    def kernel(x_ref, adj_ref, add1_ref, add2_ref,
               g1_ref, be1_ref, w1_ref,
               g2_ref, be2_ref, w2_ref,
               *rest):
        if has_skip_proj:
            wskip_ref, bskip_ref, out_ref = rest
        else:
            (out_ref,) = rest

        x = x_ref[...].astype(jnp.float32)   # (B*N, Cin)  f32
        adj = adj_ref[...]                   # (N, N)      bf16 (pre-cast in wrapper)

        # ---- norm1 ---------------------------------------------------------
        h = _layernorm(x, g1_ref[...], be1_ref[...])

        # ---- conv1: adjacency aggregation + channel projection -------------
        if agg_first_conv1:
            # Cin < Cout: run the N*N matmul at the narrower width Cin.
            agg = _batched_adj_matmul(adj, h, B, N)                 # (B*N, Cin)
            h = jnp.dot(agg.astype(jnp.bfloat16), w1_ref[...],
                        preferred_element_type=jnp.float32)        # (B*N, Cout)
        else:
            hw = jnp.dot(h.astype(jnp.bfloat16), w1_ref[...],
                         preferred_element_type=jnp.float32)       # (B*N, Cout)
            h = _batched_adj_matmul(adj, hw, B, N)

        # GCN bias + hoisted time projection, pre-folded per row in wrapper.
        h = h + add1_ref[...]
        h = _silu(h)
        # dropout: identity in eval mode

        # ---- norm2 + conv2 (square: project first = one big GEMM) ----------
        h = _layernorm(h, g2_ref[...], be2_ref[...])
        hw = jnp.dot(h.astype(jnp.bfloat16), w2_ref[...],
                     preferred_element_type=jnp.float32)           # (B*N, Cout)
        h = _batched_adj_matmul(adj, hw, B, N)
        h = h + add2_ref[...]
        h = _silu(h)
        # dropout: identity in eval mode

        # ---- residual skip --------------------------------------------------
        if has_skip_proj:
            skip = jnp.dot(x.astype(jnp.bfloat16), wskip_ref[...],
                           preferred_element_type=jnp.float32) + bskip_ref[...]
        else:
            skip = x   # nn.Identity: no matmul emitted, no weights DMA'd

        out_ref[...] = (h + skip).astype(out_ref.dtype)

    return kernel


def _full_spec(shape):
    nd = len(shape)
    return pl.BlockSpec(shape, lambda i, _nd=nd: (0,) * _nd)


def graph_conv_block(x, adj, t_emb, params):
    B, N, Cin = x.shape
    Cout = params["w1"].shape[1]
    has_skip_proj = "wskip" in params
    agg_first_conv1 = Cin < Cout

    # --- hoisted preprocessing (cheap XLA ops, not worth MXU pipeline slots) --
    # Time projections as one batched GEMM each, folded with the GCN bias into
    # a single per-row additive term of shape (B*N, Cout).
    time1 = jnp.dot(t_emb, params["wt1"]) + params["bt1"]     # (B, Cout)
    time2 = jnp.dot(t_emb, params["wt2"]) + params["bt2"]
    add1 = jnp.repeat(time1 + params["b1"], N, axis=0)        # (B*N, Cout)
    add2 = jnp.repeat(time2 + params["b2"], N, axis=0)

    x2 = x.reshape(B * N, Cin).astype(jnp.float32)
    adj_bf = adj.astype(jnp.bfloat16)      # bf16 MXU operand; halves adj DMA bytes
    w1_bf = params["w1"].astype(jnp.bfloat16)
    w2_bf = params["w2"].astype(jnp.bfloat16)

    args = [x2, adj_bf, add1, add2,
            params["g1"], params["be1"], w1_bf,
            params["g2"], params["be2"], w2_bf]
    if has_skip_proj:
        args += [params["wskip"].astype(jnp.bfloat16), params["bskip"]]

    # --- advisory cost estimate ------------------------------------------------
    flops = 2 * B * (N * N * (Cin if agg_first_conv1 else Cout)   # conv1 aggregation
                     + N * Cin * Cout                             # conv1 projection
                     + N * Cout * Cout                            # conv2 projection
                     + N * N * Cout)                              # conv2 aggregation
    if has_skip_proj:
        flops += 2 * B * N * Cin * Cout
    transcendentals = 2 * B * N * Cout + 2 * B * N                # 2 sigmoids + 2 rsqrt/row
    bytes_accessed = sum(int(a.size) * a.dtype.itemsize for a in args) \
        + B * N * Cout * 4

    kernel = _make_kernel(B, N, agg_first_conv1, has_skip_proj)

    out2d = pl.pallas_call(
        kernel,
        out_shape=jax.ShapeDtypeStruct((B * N, Cout), jnp.float32),
        grid_spec=pltpu.PrefetchScalarGridSpec(
            num_scalar_prefetch=0,
            grid=(1,),                     # batch grid collapsed: one invocation
            in_specs=[_full_spec(a.shape) for a in args],
            out_specs=pl.BlockSpec((B * N, Cout), lambda i: (0, 0)),
        ),
        compiler_params=pltpu.CompilerParams(
            dimension_semantics=("arbitrary",),
        ),
        cost_estimate=pl.CostEstimate(
            flops=flops,
            transcendentals=transcendentals,
            bytes_accessed=bytes_accessed,
        ),
    )(*args)
    return out2d.reshape(B, N, Cout)


def build_gcn_adj(edge_index, num_nodes):
    """Dense D^-1/2 (A + I) D^-1/2 matching torch_geometric GCNConv defaults.

    NOTE: duplicate edges are clamped (unweighted simple graphs only).
    """
    src, dst = edge_index
    A = jnp.zeros((num_nodes, num_nodes), jnp.float32).at[dst, src].add(1.0)
    A = jnp.minimum(A, 1.0) + jnp.eye(num_nodes, dtype=jnp.float32)
    deg = A.sum(axis=1)
    dinv = jax.lax.rsqrt(deg)
    return A * dinv[:, None] * dinv[None, :]


def init_params(key, in_channels, out_channels, time_channels):
    ks = jax.random.split(key, 10)
    scale = 0.1

    def w(k, shape):
        return scale * jax.random.normal(k, shape, dtype=jnp.float32)

    params = {
        # LayerNorm 1 / 2
        "g1": jnp.ones((1, in_channels), jnp.float32),
        "be1": jnp.zeros((1, in_channels), jnp.float32),
        "g2": jnp.ones((1, out_channels), jnp.float32),
        "be2": jnp.zeros((1, out_channels), jnp.float32),
        # GCNConv 1 + time projection 1
        "w1": w(ks[0], (in_channels, out_channels)),
        "b1": w(ks[1], (1, out_channels)),
        "wt1": w(ks[2], (time_channels, out_channels)),
        "bt1": w(ks[3], (1, out_channels)),
        # GCNConv 2 + time projection 2
        "w2": w(ks[4], (out_channels, out_channels)),
        "b2": w(ks[5], (1, out_channels)),
        "wt2": w(ks[6], (time_channels, out_channels)),
        "bt2": w(ks[7], (1, out_channels)),
    }
    if in_channels != out_channels:
        params["wskip"] = w(ks[8], (in_channels, out_channels))
        params["bskip"] = jnp.zeros((1, out_channels), jnp.float32)
    # else: nn.Identity skip -> handled at trace time, no parameters needed.
    return params


def graph_conv_block_ref(x, adj, t_emb, params):
    """Pure-JAX f32 reference matching the PyTorch forward (eval mode)."""
    def ln(v, g, b):
        mu = v.mean(-1, keepdims=True)
        var = jnp.square(v - mu).mean(-1, keepdims=True)
        return (v - mu) * jax.lax.rsqrt(var + 1e-5) * g + b

    def gcn(v, w_, b_):
        return jnp.einsum("ij,bjc->bic", adj, jnp.einsum("bnc,co->bno", v, w_)) + b_

    h = ln(x, params["g1"], params["be1"])
    h = gcn(h, params["w1"], params["b1"])
    h = h + (t_emb @ params["wt1"] + params["bt1"])[:, None, :]
    h = jax.nn.silu(h)
    h = ln(h, params["g2"], params["be2"])
    h = gcn(h, params["w2"], params["b2"])
    h = h + (t_emb @ params["wt2"] + params["bt2"])[:, None, :]
    h = jax.nn.silu(h)
    if "wskip" in params:
        skip = x @ params["wskip"] + params["bskip"]
    else:
        skip = x
    return h + skip


if __name__ == "__main__":
    B, N = 2, 8                 # batch, nodes
    Cin, Cout, Tc = 16, 32, 32  # in_channels, out_channels, time_channels

    key = jax.random.PRNGKey(0)
    kx, kt, kp = jax.random.split(key, 3)

    x = jax.random.normal(kx, (B, N, Cin), dtype=jnp.float32)
    t_emb = jax.random.normal(kt, (B, Tc), dtype=jnp.float32)

    # deterministic ring graph (bidirectional edges), shared across batch
    src = jnp.arange(N, dtype=jnp.int32)
    dst = (src + 1) % N
    edge_index = jnp.stack(
        [jnp.concatenate([src, dst]), jnp.concatenate([dst, src])], axis=0
    )
    adj = build_gcn_adj(edge_index, N)

    params = init_params(kp, Cin, Cout, Tc)

    out = graph_conv_block(x, adj, t_emb, params)
    jax.block_until_ready(out)
    assert out.shape == (B, N, Cout)

    ref = graph_conv_block_ref(x, adj, t_emb, params)
    max_err = float(jnp.max(jnp.abs(out - ref)))
    assert jnp.allclose(out, ref, rtol=5e-2, atol=5e-2), max_err

    print("KERNEL_OK")
</pallas_src>

<mosaic_0001>
module attributes {stable_mosaic.version = 11 : i64} {
  func.func @kernel(%arg0: i32, %arg1: memref<16x16xf32, #tpu.memory_space<vmem>>, %arg2: memref<8x8xbf16, #tpu.memory_space<vmem>>, %arg3: memref<16x32xf32, #tpu.memory_space<vmem>>, %arg4: memref<16x32xf32, #tpu.memory_space<vmem>>, %arg5: memref<1x16xf32, #tpu.memory_space<vmem>>, %arg6: memref<1x16xf32, #tpu.memory_space<vmem>>, %arg7: memref<16x32xbf16, #tpu.memory_space<vmem>>, %arg8: memref<1x32xf32, #tpu.memory_space<vmem>>, %arg9: memref<1x32xf32, #tpu.memory_space<vmem>>, %arg10: memref<32x32xbf16, #tpu.memory_space<vmem>>, %arg11: memref<16x32xbf16, #tpu.memory_space<vmem>>, %arg12: memref<1x32xf32, #tpu.memory_space<vmem>>, %arg13: memref<16x32xf32, #tpu.memory_space<vmem>>) attributes {dimension_semantics = [#tpu.dimension_semantics<arbitrary>], iteration_bounds = array<i64: 1>, scalar_prefetch = 0 : i64, scratch_operands = 0 : i64, tpu.core_type = #tpu.core_type<tc>, window_params = [{pipeline_mode = #tpu.pipeline_mode<synchronous>, transform_indices = @transform_0, window_bounds = array<i64: 16, 16>}, {pipeline_mode = #tpu.pipeline_mode<synchronous>, transform_indices = @transform_1, window_bounds = array<i64: 8, 8>}, {pipeline_mode = #tpu.pipeline_mode<synchronous>, transform_indices = @transform_2, window_bounds = array<i64: 16, 32>}, {pipeline_mode = #tpu.pipeline_mode<synchronous>, transform_indices = @transform_3, window_bounds = array<i64: 16, 32>}, {pipeline_mode = #tpu.pipeline_mode<synchronous>, transform_indices = @transform_4, window_bounds = array<i64: 1, 16>}, {pipeline_mode = #tpu.pipeline_mode<synchronous>, transform_indices = @transform_5, window_bounds = array<i64: 1, 16>}, {pipeline_mode = #tpu.pipeline_mode<synchronous>, transform_indices = @transform_6, window_bounds = array<i64: 16, 32>}, {pipeline_mode = #tpu.pipeline_mode<synchronous>, transform_indices = @transform_7, window_bounds = array<i64: 1, 32>}, {pipeline_mode = #tpu.pipeline_mode<synchronous>, transform_indices = @transform_8, window_bounds = array<i64: 1, 32>}, {pipeline_mode = #tpu.pipeline_mode<synchronous>, transform_indices = @transform_9, window_bounds = array<i64: 32, 32>}, {pipeline_mode = #tpu.pipeline_mode<synchronous>, transform_indices = @transform_10, window_bounds = array<i64: 16, 32>}, {pipeline_mode = #tpu.pipeline_mode<synchronous>, transform_indices = @transform_11, window_bounds = array<i64: 1, 32>}, {pipeline_mode = #tpu.pipeline_mode<synchronous>, transform_indices = @transform_12, window_bounds = array<i64: 16, 32>}]} {
    %c0 = arith.constant 0 : index
    %c0_0 = arith.constant 0 : index
    %0 = vector.load %arg1[%c0, %c0_0] : memref<16x16xf32, #tpu.memory_space<vmem>>, vector<16x16xf32>
    %c0_1 = arith.constant 0 : index
    %c0_2 = arith.constant 0 : index
    %1 = vector.load %arg2[%c0_1, %c0_2] : memref<8x8xbf16, #tpu.memory_space<vmem>>, vector<8x8xbf16>
    %c0_3 = arith.constant 0 : index
    %c0_4 = arith.constant 0 : index
    %2 = vector.load %arg5[%c0_3, %c0_4] : memref<1x16xf32, #tpu.memory_space<vmem>>, vector<1x16xf32>
    %c0_5 = arith.constant 0 : index
    %c0_6 = arith.constant 0 : index
    %3 = vector.load %arg6[%c0_5, %c0_6] : memref<1x16xf32, #tpu.memory_space<vmem>>, vector<1x16xf32>
    %cst = arith.constant dense<0.000000e+00> : vector<16xf32>
    %4 = vector.multi_reduction <add>, %0, %cst [1] : vector<16x16xf32> to vector<16xf32>
    %5 = vector.shape_cast %4 : vector<16xf32> to vector<16x1xf32>
    %cst_7 = arith.constant 1.600000e+01 : f32
    %6 = vector.broadcast %cst_7 : f32 to vector<16x1xf32>
    %7 = arith.divf %5, %6 : vector<16x1xf32>
    %8 = vector.broadcast %7 : vector<16x1xf32> to vector<16x16xf32>
    %9 = arith.subf %0, %8 : vector<16x16xf32>
    %10 = arith.mulf %9, %9 : vector<16x16xf32>
    %cst_8 = arith.constant dense<0.000000e+00> : vector<16xf32>
    %11 = vector.multi_reduction <add>, %10, %cst_8 [1] : vector<16x16xf32> to vector<16xf32>
    %12 = vector.shape_cast %11 : vector<16xf32> to vector<16x1xf32>
    %cst_9 = arith.constant 1.600000e+01 : f32
    %13 = vector.broadcast %cst_9 : f32 to vector<16x1xf32>
    %14 = arith.divf %12, %13 : vector<16x1xf32>
    %15 = vector.broadcast %7 : vector<16x1xf32> to vector<16x16xf32>
    %16 = arith.subf %0, %15 : vector<16x16xf32>
    %cst_10 = arith.constant 9.99999974E-6 : f32
    %17 = vector.broadcast %cst_10 : f32 to vector<16x1xf32>
    %18 = arith.addf %14, %17 : vector<16x1xf32>
    %19 = math.rsqrt %18 : vector<16x1xf32>
    %20 = vector.broadcast %19 : vector<16x1xf32> to vector<16x16xf32>
    %21 = arith.mulf %16, %20 : vector<16x16xf32>
    %22 = vector.broadcast %2 : vector<1x16xf32> to vector<16x16xf32>
    %23 = arith.mulf %21, %22 : vector<16x16xf32>
    %24 = vector.broadcast %3 : vector<1x16xf32> to vector<16x16xf32>
    %25 = arith.addf %23, %24 : vector<16x16xf32>
    %26 = arith.truncf %25 : vector<16x16xf32> to vector<16x16xbf16>
    %27 = vector.extract_strided_slice %26 {offsets = [0, 0], sizes = [8, 16], strides = [1, 1]} : vector<16x16xbf16> to vector<8x16xbf16>
    %cst_11 = arith.constant dense<0.000000e+00> : vector<8x16xf32>
    %28 = tpu.matmul %1, %27, %cst_11 {dimension_numbers = #tpu.dot_dimension_numbers<[1], [0], [0], [1], [0, 0, 1, 1], [], []>} : vector<8x8xbf16>, vector<8x16xbf16>, vector<8x16xf32> -> vector<8x16xf32>
    %29 = vector.extract_strided_slice %26 {offsets = [8, 0], sizes = [8, 16], strides = [1, 1]} : vector<16x16xbf16> to vector<8x16xbf16>
    %cst_12 = arith.constant dense<0.000000e+00> : vector<8x16xf32>
    %30 = tpu.matmul %1, %29, %cst_12 {dimension_numbers = #tpu.dot_dimension_numbers<[1], [0], [0], [1], [0, 0, 1, 1], [], []>} : vector<8x8xbf16>, vector<8x16xbf16>, vector<8x16xf32> -> vector<8x16xf32>
    %31 = tpu.concatenate %28, %30 in 0 : vector<8x16xf32>, vector<8x16xf32> -> vector<16x16xf32>
    %32 = arith.truncf %31 : vector<16x16xf32> to vector<16x16xbf16>
    %c0_13 = arith.constant 0 : index
    %c0_14 = arith.constant 0 : index
    %33 = vector.load %arg7[%c0_13, %c0_14] : memref<16x32xbf16, #tpu.memory_space<vmem>>, vector<16x32xbf16>
    %cst_15 = arith.constant dense<0.000000e+00> : vector<16x32xf32>
    %34 = tpu.matmul %32, %33, %cst_15 {dimension_numbers = #tpu.dot_dimension_numbers<[1], [0], [0], [1], [0, 0, 1, 1], [], []>} : vector<16x16xbf16>, vector<16x32xbf16>, vector<16x32xf32> -> vector<16x32xf32>
    %c0_16 = arith.constant 0 : index
    %c0_17 = arith.constant 0 : index
    %35 = vector.load %arg3[%c0_16, %c0_17] : memref<16x32xf32, #tpu.memory_space<vmem>>, vector<16x32xf32>
    %36 = arith.addf %34, %35 : vector<16x32xf32>
    %37 = arith.negf %36 : vector<16x32xf32>
    %38 = math.exp %37 : vector<16x32xf32>
    %cst_18 = arith.constant 1.000000e+00 : f32
    %39 = vector.broadcast %cst_18 : f32 to vector<16x32xf32>
    %40 = arith.addf %39, %38 : vector<16x32xf32>
    %41 = arith.divf %39, %40 : vector<16x32xf32>
    %42 = arith.mulf %36, %41 : vector<16x32xf32>
    %c0_19 = arith.constant 0 : index
    %c0_20 = arith.constant 0 : index
    %43 = vector.load %arg8[%c0_19, %c0_20] : memref<1x32xf32, #tpu.memory_space<vmem>>, vector<1x32xf32>
    %c0_21 = arith.constant 0 : index
    %c0_22 = arith.constant 0 : index
    %44 = vector.load %arg9[%c0_21, %c0_22] : memref<1x32xf32, #tpu.memory_space<vmem>>, vector<1x32xf32>
    %cst_23 = arith.constant dense<0.000000e+00> : vector<16xf32>
    %45 = vector.multi_reduction <add>, %42, %cst_23 [1] : vector<16x32xf32> to vector<16xf32>
    %46 = vector.shape_cast %45 : vector<16xf32> to vector<16x1xf32>
    %cst_24 = arith.constant 3.200000e+01 : f32
    %47 = vector.broadcast %cst_24 : f32 to vector<16x1xf32>
    %48 = arith.divf %46, %47 : vector<16x1xf32>
    %49 = vector.broadcast %48 : vector<16x1xf32> to vector<16x32xf32>
    %50 = arith.subf %42, %49 : vector<16x32xf32>
    %51 = arith.mulf %50, %50 : vector<16x32xf32>
    %cst_25 = arith.constant dense<0.000000e+00> : vector<16xf32>
    %52 = vector.multi_reduction <add>, %51, %cst_25 [1] : vector<16x32xf32> to vector<16xf32>
    %53 = vector.shape_cast %52 : vector<16xf32> to vector<16x1xf32>
    %cst_26 = arith.constant 3.200000e+01 : f32
    %54 = vector.broadcast %cst_26 : f32 to vector<16x1xf32>
    %55 = arith.divf %53, %54 : vector<16x1xf32>
    %56 = vector.broadcast %48 : vector<16x1xf32> to vector<16x32xf32>
    %57 = arith.subf %42, %56 : vector<16x32xf32>
    %cst_27 = arith.constant 9.99999974E-6 : f32
    %58 = vector.broadcast %cst_27 : f32 to vector<16x1xf32>
    %59 = arith.addf %55, %58 : vector<16x1xf32>
    %60 = math.rsqrt %59 : vector<16x1xf32>
    %61 = vector.broadcast %60 : vector<16x1xf32> to vector<16x32xf32>
    %62 = arith.mulf %57, %61 : vector<16x32xf32>
    %63 = vector.broadcast %43 : vector<1x32xf32> to vector<16x32xf32>
    %64 = arith.mulf %62, %63 : vector<16x32xf32>
    %65 = vector.broadcast %44 : vector<1x32xf32> to vector<16x32xf32>
    %66 = arith.addf %64, %65 : vector<16x32xf32>
    %67 = arith.truncf %66 : vector<16x32xf32> to vector<16x32xbf16>
    %c0_28 = arith.constant 0 : index
    %c0_29 = arith.constant 0 : index
    %68 = vector.load %arg10[%c0_28, %c0_29] : memref<32x32xbf16, #tpu.memory_space<vmem>>, vector<32x32xbf16>
    %cst_30 = arith.constant dense<0.000000e+00> : vector<16x32xf32>
    %69 = tpu.matmul %67, %68, %cst_30 {dimension_numbers = #tpu.dot_dimension_numbers<[1], [0], [0], [1], [0, 0, 1, 1], [], []>} : vector<16x32xbf16>, vector<32x32xbf16>, vector<16x32xf32> -> vector<16x32xf32>
    %70 = arith.truncf %69 : vector<16x32xf32> to vector<16x32xbf16>
    %71 = vector.extract_strided_slice %70 {offsets = [0, 0], sizes = [8, 32], strides = [1, 1]} : vector<16x32xbf16> to vector<8x32xbf16>
    %cst_31 = arith.constant dense<0.000000e+00> : vector<8x32xf32>
    %72 = tpu.matmul %1, %71, %cst_31 {dimension_numbers = #tpu.dot_dimension_numbers<[1], [0], [0], [1], [0, 0, 1, 1], [], []>} : vector<8x8xbf16>, vector<8x32xbf16>, vector<8x32xf32> -> vector<8x32xf32>
    %73 = vector.extract_strided_slice %70 {offsets = [8, 0], sizes = [8, 32], strides = [1, 1]} : vector<16x32xbf16> to vector<8x32xbf16>
    %cst_32 = arith.constant dense<0.000000e+00> : vector<8x32xf32>
    %74 = tpu.matmul %1, %73, %cst_32 {dimension_numbers = #tpu.dot_dimension_numbers<[1], [0], [0], [1], [0, 0, 1, 1], [], []>} : vector<8x8xbf16>, vector<8x32xbf16>, vector<8x32xf32> -> vector<8x32xf32>
    %75 = tpu.concatenate %72, %74 in 0 : vector<8x32xf32>, vector<8x32xf32> -> vector<16x32xf32>
    %c0_33 = arith.constant 0 : index
    %c0_34 = arith.constant 0 : index
    %76 = vector.load %arg4[%c0_33, %c0_34] : memref<16x32xf32, #tpu.memory_space<vmem>>, vector<16x32xf32>
    %77 = arith.addf %75, %76 : vector<16x32xf32>
    %78 = arith.negf %77 : vector<16x32xf32>
    %79 = math.exp %78 : vector<16x32xf32>
    %cst_35 = arith.constant 1.000000e+00 : f32
    %80 = vector.broadcast %cst_35 : f32 to vector<16x32xf32>
    %81 = arith.addf %80, %79 : vector<16x32xf32>
    %82 = arith.divf %80, %81 : vector<16x32xf32>
    %83 = arith.mulf %77, %82 : vector<16x32xf32>
    %84 = arith.truncf %0 : vector<16x16xf32> to vector<16x16xbf16>
    %c0_36 = arith.constant 0 : index
    %c0_37 = arith.constant 0 : index
    %85 = vector.load %arg11[%c0_36, %c0_37] : memref<16x32xbf16, #tpu.memory_space<vmem>>, vector<16x32xbf16>
    %cst_38 = arith.constant dense<0.000000e+00> : vector<16x32xf32>
    %86 = tpu.matmul %84, %85, %cst_38 {dimension_numbers = #tpu.dot_dimension_numbers<[1], [0], [0], [1], [0, 0, 1, 1], [], []>} : vector<16x16xbf16>, vector<16x32xbf16>, vector<16x32xf32> -> vector<16x32xf32>
    %c0_39 = arith.constant 0 : index
    %c0_40 = arith.constant 0 : index
    %87 = vector.load %arg12[%c0_39, %c0_40] : memref<1x32xf32, #tpu.memory_space<vmem>>, vector<1x32xf32>
    %88 = vector.broadcast %87 : vector<1x32xf32> to vector<16x32xf32>
    %89 = arith.addf %86, %88 : vector<16x32xf32>
    %90 = arith.addf %83, %89 : vector<16x32xf32>
    %c0_41 = arith.constant 0 : index
    %c0_42 = arith.constant 0 : index
    %91 = vector.load %arg13[%c0_41, %c0_42] : memref<16x32xf32, #tpu.memory_space<vmem>>, vector<16x32xf32>
    tpu.vector_store %arg13[%c0_41, %c0_42], %90 {strides = array<i32>} : memref<16x32xf32, #tpu.memory_space<vmem>>, vector<16x32xf32>,
    return
  }
  func.func @transform_0(%arg0: i32) -> (i32, i32) {
    %c0_i32 = arith.constant 0 : i32
    %c0_i32_0 = arith.constant 0 : i32
    %c0_i32_1 = arith.constant 0 : i32
    return %c0_i32, %c0_i32_0 : i32, i32
  }
  func.func @transform_1(%arg0: i32) -> (i32, i32) {
    %c0_i32 = arith.constant 0 : i32
    %c0_i32_0 = arith.constant 0 : i32
    %c0_i32_1 = arith.constant 0 : i32
    return %c0_i32, %c0_i32_0 : i32, i32
  }
  func.func @transform_2(%arg0: i32) -> (i32, i32) {
    %c0_i32 = arith.constant 0 : i32
    %c0_i32_0 = arith.constant 0 : i32
    %c0_i32_1 = arith.constant 0 : i32
    return %c0_i32, %c0_i32_0 : i32, i32
  }
  func.func @transform_3(%arg0: i32) -> (i32, i32) {
    %c0_i32 = arith.constant 0 : i32
    %c0_i32_0 = arith.constant 0 : i32
    %c0_i32_1 = arith.constant 0 : i32
    return %c0_i32, %c0_i32_0 : i32, i32
  }
  func.func @transform_4(%arg0: i32) -> (i32, i32) {
    %c0_i32 = arith.constant 0 : i32
    %c0_i32_0 = arith.constant 0 : i32
    %c0_i32_1 = arith.constant 0 : i32
    return %c0_i32, %c0_i32_0 : i32, i32
  }
  func.func @transform_5(%arg0: i32) -> (i32, i32) {
    %c0_i32 = arith.constant 0 : i32
    %c0_i32_0 = arith.constant 0 : i32
    %c0_i32_1 = arith.constant 0 : i32
    return %c0_i32, %c0_i32_0 : i32, i32
  }
  func.func @transform_6(%arg0: i32) -> (i32, i32) {
    %c0_i32 = arith.constant 0 : i32
    %c0_i32_0 = arith.constant 0 : i32
    %c0_i32_1 = arith.constant 0 : i32
    return %c0_i32, %c0_i32_0 : i32, i32
  }
  func.func @transform_7(%arg0: i32) -> (i32, i32) {
    %c0_i32 = arith.constant 0 : i32
    %c0_i32_0 = arith.constant 0 : i32
    %c0_i32_1 = arith.constant 0 : i32
    return %c0_i32, %c0_i32_0 : i32, i32
  }
  func.func @transform_8(%arg0: i32) -> (i32, i32) {
    %c0_i32 = arith.constant 0 : i32
    %c0_i32_0 = arith.constant 0 : i32
    %c0_i32_1 = arith.constant 0 : i32
    return %c0_i32, %c0_i32_0 : i32, i32
  }
  func.func @transform_9(%arg0: i32) -> (i32, i32) {
    %c0_i32 = arith.constant 0 : i32
    %c0_i32_0 = arith.constant 0 : i32
    %c0_i32_1 = arith.constant 0 : i32
    return %c0_i32, %c0_i32_0 : i32, i32
  }
  func.func @transform_10(%arg0: i32) -> (i32, i32) {
    %c0_i32 = arith.constant 0 : i32
    %c0_i32_0 = arith.constant 0 : i32
    %c0_i32_1 = arith.constant 0 : i32
    return %c0_i32, %c0_i32_0 : i32, i32
  }
  func.func @transform_11(%arg0: i32) -> (i32, i32) {
    %c0_i32 = arith.constant 0 : i32
    %c0_i32_0 = arith.constant 0 : i32
    %c0_i32_1 = arith.constant 0 : i32
    return %c0_i32, %c0_i32_0 : i32, i32
  }
  func.func @transform_12(%arg0: i32) -> (i32, i32) {
    %c0_i32 = arith.constant 0 : i32
    %c0_i32_0 = arith.constant 0 : i32
    %c0_i32_1 = arith.constant 0 : i32
    return %c0_i32, %c0_i32_0 : i32, i32
  }
}

</mosaic_0001>

<bundles_post_ra>
// kernel: tpu_custom_call.1
= control target key start
LH: loop header
LB: loop body
LE: loop exit
PB: predicated region body
PF: predicated region fallthrough
CT: control target
= control target key end

     0   :  { %17 = vsyncpa [#allocation3], 0  ;;  %s1234_s0 = inlined_call_operand.hbm [shape: f32[16,16], index: 0, kind: input, shape index: {}]   ;;  %s1235_s1 = inlined_call_operand.hbm [shape: bf16[8,8], index: 1, kind: input, shape index: {}]   ;;  %s1236_s2 = inlined_call_operand.hbm [shape: f32[16,32], index: 2, kind: input, shape index: {}]   ;;  %s1237_s3 = inlined_call_operand.hbm [shape: f32[16,32], index: 3, kind: input, shape index: {}]   ;;  %s1238_s4 = inlined_call_operand.hbm [shape: f32[1,16], index: 4, kind: input, shape index: {}]   ;;  %s1239_s5 = inlined_call_operand.hbm [shape: f32[1,16], index: 5, kind: input, shape index: {}]   ;;  %s1240_s6 = inlined_call_operand.hbm [shape: bf16[16,32], index: 6, kind: input, shape index: {}]   ;;  %s1241_s7 = inlined_call_operand.hbm [shape: f32[1,32], index: 7, kind: input, shape index: {}]   ;;  %s1242_s8 = inlined_call_operand.hbm [shape: f32[1,32], index: 8, kind: input, shape index: {}]   ;;  %s1243_s9 = inlined_call_operand.vmem [shape: bf16[32,32], index: 9, kind: input, shape index: {}]   ;;  %s1244_s10 = inlined_call_operand.hbm [shape: bf16[16,32], index: 10, kind: input, shape index: {}]   ;;  %s1245_s11 = inlined_call_operand.vmem [shape: f32[1,32], index: 11, kind: input, shape index: {}]   ;;  %s1246_s12 = inlined_call_operand.hbm [shape: f32[16,32], index: 12, kind: output, shape index: {}]  }
   0x1   :  { %18 = vsyncpa [#allocation6], 0 }
   0x2   :  { %19 = vsyncpa [#allocation9], 0 }
   0x3   :  { %20 = vsyncpa [#allocation12], 0 }
   0x4   :  { %21 = vsyncpa [#allocation15], 0 }
   0x5   :  { %22 = vsyncpa [#allocation18], 0 }
   0x6   :  { %23 = vsyncpa [#allocation4], 0  ;;  %s1039_s21 = smov [#allocation5]  }
   0x7   :  { %s42_s22 = sshll.u32 %s1039_s21, 4  ;;  %s43_s22 = int_to_ptr.vmem [resolvable:$true] %s42_s22 }
   0x8   :  { %s813_s23 = scalar_lea.vmem %s43_s22, 64  ;;  %p818_p1 = scmp.lt.s32.totalorder %s43_s22, %s43_s22 }
   0x9   :  { %p814_p0 = scmp.ne.s32.totalorder %s43_s22, %s813_s23  ;;  %p819_p2 = scmp.lt.s32.totalorder %s813_s23, %s813_s23 }
   0xb   :  { %p820_p3 = por %p819_p2, %p818_p1 }
   0xd   :  { %p821_p4 = pnand %p820_p3, %p814_p0 }
   0xf   :  { %824 = shalt.err (!%p821_p4)
}
  0x10   :  { %45 = dma.hbm_to_vmem [thread:$0]  %s1235_s1, 64, %s43_s22, [#allocation6]  }
  0x11   :  { %s1040_s26 = smov [#allocation8]   ;;  %s1041_s28 = smov [#allocation11]  }
  0x12   :  { %s63_s27 = sshll.u32 %s1040_s26, 4  ;;  %s86_s29 = sshll.u32 %s1041_s28, 4  ;;  %s64_s27 = int_to_ptr.vmem [resolvable:$true] %s63_s27  ;;  %s87_s29 = int_to_ptr.vmem [resolvable:$true] %s86_s29 }
  0x13   :  { %s833_s30 = scalar_lea.vmem %s64_s27, 256  ;;  %p838_p6 = scmp.lt.s32.totalorder %s64_s27, %s64_s27 }
  0x14   :  { %p834_p5 = scmp.ne.s32.totalorder %s64_s27, %s833_s30  ;;  %p839_p7 = scmp.lt.s32.totalorder %s833_s30, %s833_s30 }
  0x16   :  { %p840_p8 = por %p839_p7, %p838_p6 }
  0x18   :  { %p841_p9 = pnand %p840_p8, %p834_p5 }
  0x1a   :  { %844 = shalt.err (!%p841_p9)
}
  0x1b   :  { %s1042_s13 = smov 128   ;;  %s1043_s14 = smov 8  }
  0x1c   :  { %69 = dma.hbm_to_vmem [thread:$0]  %s1237_s3, 256, %s64_s27, [#allocation9], %s1042_s13, %s1042_s13, %s1043_s14  }
  0x1d   :  { %s853_s1 = scalar_lea.vmem %s87_s29, 16  ;;  %s857_s17 = scalar_lea.vmem %s87_s29, 32 }
  0x1e   :  { %p854_p10 = scmp.ne.s32.totalorder %s87_s29, %s853_s1  ;;  %p858_p11 = scmp.lt.s32.totalorder %s87_s29, %s87_s29 }
  0x1f   :  { %p859_p12 = scmp.lt.s32.totalorder %s857_s17, %s853_s1 }
  0x21   :  { %p860_p13 = por %p859_p12, %p858_p11 }
  0x23   :  { %p861_p0 = pnand %p860_p13, %p854_p10 }
  0x25   :  { %864 = shalt.err (!%p861_p0)
}
  0x26   :  { %89 = dma.hbm_to_vmem [thread:$0]  %s1239_s5, 16, %s87_s29, [#allocation12]  }
  0x27   :  { %s1044_s20 = smov [#allocation14]   ;;  %s1045_s22 = smov [#allocation2]  }
  0x28   :  { %s108_s21 = sshll.u32 %s1044_s20, 4  ;;  %s29_s23 = sshll.u32 %s1045_s22, 4  ;;  %s109_s21 = int_to_ptr.vmem [resolvable:$true] %s108_s21  ;;  %s30_s23 = int_to_ptr.vmem [resolvable:$true] %s29_s23 }
  0x29   :  { %s873_s24 = scalar_lea.vmem %s109_s21, 16  ;;  %s877_s3 = scalar_lea.vmem %s109_s21, 32 }
  0x2a   :  { %p874_p1 = scmp.ne.s32.totalorder %s109_s21, %s873_s24  ;;  %p878_p2 = scmp.lt.s32.totalorder %s109_s21, %s109_s21 }
  0x2b   :  { %p879_p3 = scmp.lt.s32.totalorder %s877_s3, %s873_s24 }
  0x2d   :  { %p880_p4 = por %p879_p3, %p878_p2 }
  0x2f   :  { %p881_p5 = pnand %p880_p4, %p874_p1 }
  0x31   :  { %884 = shalt.err (!%p881_p5)
}
  0x32   :  { %111 = dma.hbm_to_vmem [thread:$0]  %s1241_s7, 16, %s109_s21, [#allocation15]  }
  0x33   :  { %s893_s27 = scalar_lea.vmem %s30_s23, 256  ;;  %p898_p7 = scmp.lt.s32.totalorder %s30_s23, %s30_s23 }
  0x34   :  { %p894_p6 = scmp.ne.s32.totalorder %s30_s23, %s893_s27  ;;  %p899_p8 = scmp.lt.s32.totalorder %s893_s27, %s893_s27 }
  0x36   :  { %p900_p9 = por %p899_p8, %p898_p7 }
  0x38   :  { %p901_p10 = pnand %p900_p9, %p894_p6 }
  0x3a   :  { %904 = shalt.err (!%p901_p10)
}
  0x3b   :  { %35 = dma.hbm_to_vmem [thread:$0]  %s1234_s0, 256, %s30_s23, [#allocation3], %s1042_s13, %s1042_s13, %s1043_s14  }
  0x3c   :  { %s1046_s29 = smov [#allocation7]   ;;  %s1047_s15 = smov [#allocation10]  }
  0x3d   :  { %s51_s30 = sshll.u32 %s1046_s29, 4  ;;  %s76_s7 = sshll.u32 %s1047_s15, 4  ;;  %s52_s30 = int_to_ptr.vmem [resolvable:$true] %s51_s30  ;;  %s77_s7 = int_to_ptr.vmem [resolvable:$true] %s76_s7 }
  0x3e   :  { %s913_s16 = scalar_lea.vmem %s52_s30, 256  ;;  %p918_p12 = scmp.lt.s32.totalorder %s52_s30, %s52_s30 }
  0x3f   :  { %p914_p11 = scmp.ne.s32.totalorder %s52_s30, %s913_s16  ;;  %p919_p13 = scmp.lt.s32.totalorder %s913_s16, %s913_s16 }
  0x41   :  { %p920_p0 = por %p919_p13, %p918_p12 }
  0x43   :  { %p921_p1 = pnand %p920_p0, %p914_p11 }
  0x45   :  { %924 = shalt.err (!%p921_p1)
}
  0x46   :  { %57 = dma.hbm_to_vmem [thread:$0]  %s1236_s2, 256, %s52_s30, [#allocation6], %s1042_s13, %s1042_s13, %s1043_s14  }
  0x47   :  { %s933_s0 = scalar_lea.vmem %s77_s7, 16  ;;  %s937_s18 = scalar_lea.vmem %s77_s7, 32 }
  0x48   :  { %p934_p2 = scmp.ne.s32.totalorder %s77_s7, %s933_s0  ;;  %p938_p3 = scmp.lt.s32.totalorder %s77_s7, %s77_s7 }
  0x49   :  { %p939_p4 = scmp.lt.s32.totalorder %s937_s18, %s933_s0 }
  0x4b   :  { %p940_p5 = por %p939_p4, %p938_p3 }
  0x4d   :  { %p941_p6 = pnand %p940_p5, %p934_p2 }
  0x4f   :  { %944 = shalt.err (!%p941_p6)
}
  0x50   :  { %79 = dma.hbm_to_vmem [thread:$0]  %s1238_s4, 16, %s77_s7, [#allocation9]  }
  0x51   :  { %s1048_s21 = smov [#allocation13]  }
  0x52   :  { %s95_s22 = sshll.u32 %s1048_s21, 4  ;;  %s96_s22 = int_to_ptr.vmem [resolvable:$true] %s95_s22 }
  0x53   :  { %s953_s23 = scalar_lea.vmem %s96_s22, 128  ;;  %p958_p8 = scmp.lt.s32.totalorder %s96_s22, %s96_s22 }
  0x54   :  { %p954_p7 = scmp.ne.s32.totalorder %s96_s22, %s953_s23  ;;  %p959_p9 = scmp.lt.s32.totalorder %s953_s23, %s953_s23 }
  0x56   :  { %p960_p10 = por %p959_p9, %p958_p8 }
  0x58   :  { %p961_p11 = pnand %p960_p10, %p954_p7 }
  0x5a   :  { %964 = shalt.err (!%p961_p11)
}
  0x5b   :  { %s1049_s2 = smov 64   ;;  %s1050_s24 = smov 4  }
  0x5c   :  { %101 = dma.hbm_to_vmem [thread:$0]  %s1240_s6, 128, %s96_s22, [#allocation12], %s1049_s2, %s1049_s2, %s1050_s24  }
  0x5d   :  { %s1051_s26 = smov [#allocation16]   ;;  %s1052_s5 = smov [#allocation17]  }
  0x5e   :  { %s118_s27 = sshll.u32 %s1051_s26, 4  ;;  %s129_s4 = sshll.u32 %s1052_s5, 4  ;;  %s119_s27 = int_to_ptr.vmem [resolvable:$true] %s118_s27  ;;  %s130_s4 = int_to_ptr.vmem [resolvable:$true] %s129_s4 }
  0x5f   :  { %s973_s28 = scalar_lea.vmem %s119_s27, 16  ;;  %s977_s29 = scalar_lea.vmem %s119_s27, 32 }
  0x60   :  { %p974_p12 = scmp.ne.s32.totalorder %s119_s27, %s973_s28  ;;  %p978_p13 = scmp.lt.s32.totalorder %s119_s27, %s119_s27 }
  0x61   :  { %p979_p0 = scmp.lt.s32.totalorder %s977_s29, %s973_s28 }
  0x63   :  { %p980_p1 = por %p979_p0, %p978_p13 }
  0x65   :  { %p981_p2 = pnand %p980_p1, %p974_p12 }
  0x67   :  { %984 = shalt.err (!%p981_p2)
}
  0x68   :  { %121 = dma.hbm_to_vmem [thread:$0]  %s1242_s8, 16, %s119_s27, [#allocation15]  }
  0x69   :  { %s993_s7 = scalar_lea.vmem %s130_s4, 128  ;;  %p998_p4 = scmp.lt.s32.totalorder %s130_s4, %s130_s4 }
  0x6a   :  { %p994_p3 = scmp.ne.s32.totalorder %s130_s4, %s993_s7  ;;  %p999_p5 = scmp.lt.s32.totalorder %s993_s7, %s993_s7 }
  0x6c   :  { %p1000_p6 = por %p999_p5, %p998_p4 }
  0x6e   :  { %p1001_p7 = pnand %p1000_p6, %p994_p3 }
  0x70   :  { %1004 = shalt.err (!%p1001_p7)
}
  0x71   :  { %135 = dma.hbm_to_vmem [thread:$0]  %s1244_s10, 128, %s130_s4, [#allocation18], %s1049_s2, %s1049_s2, %s1050_s24  }
  0x72   :  { %1025 = dma.done.wait [#allocation3], 256  }
  0x73   :  { %1026 = vsyncadd [#allocation3], 4294967040 }
  0x74   :  { %1027 = dma.done.wait [#allocation6], 320  }
  0x75   :  { %1028 = vsyncadd [#allocation6], 4294966976 }
  0x76   :  { %1029 = dma.done.wait [#allocation9], 272  }
  0x77   :  { %1030 = vsyncadd [#allocation9], 4294967024 }
  0x78   :  { %1031 = dma.done.wait [#allocation12], 144  }
  0x79   :  { %1032 = vsyncadd [#allocation12], 4294967152 }
  0x7a   :  { %1033 = dma.done.wait [#allocation15], 32  }
  0x7b   :  { %1034 = vsyncadd [#allocation15], 4294967264 }
  0x7c   :  { %1035 = dma.done.wait [#allocation18], 128  }
  0x7d   :  { %1036 = vsyncadd [#allocation18], 4294967168  ;;  %vm174_vm0 = vcmask 130048   ;;  %v1160_v0 = vld [vmem:[#allocation2] sm:$0xff]  ;;  %v1162_v1 = vld [vmem:[#allocation2 + $0x8] sm:$0xff]  ;;  %v1053_v14 = vmov 0.0  }
  0x7e   :  { %v175_v2 = vsel %vm174_vm0, %v1160_v0, 0.0  ;;  %v178_v3 = vsel %vm174_vm0, %v1162_v1, 0.0  ;;  %716 = vmatprep.subr.bf16.mxu0 %v1053_v14  ;;  %722 = vmatprep.subr.bf16.mxu1 %v1053_v14  ;;  %vm1054_vm1 = vmmov 0   ;;  %v681_v23 = vld [vmem:[#allocation10] ss:$0 sm:$0xff]  ;;  %vm223_vm2 = vcmask 1043456  }
  0x7f   :  { %176 = vadd.xlane.f32.xlu0 %v175_v2  ;;  %718 = vmatprep.mubr.msk.bf16.mxu0 %vm1054_vm1, %v1053_v14  ;;  %v682_v27 = vld [vmem:[#allocation11] ss:$0 sm:$0xff]  ;;  %v1179_v34 = vld [vmem:[#allocation5] sm:$0xf]  ;;  %vm219_vm3 = vcmask 64512   ;;  %v777_v36 = vld [vmem:[#allocation13] sm:$0xff]  }
  0x80   :  { %724 = vmatprep.mubr.msk.bf16.mxu1 %vm1054_vm1, %v1053_v14  ;;  %v315_v46 = vld [vmem:[#allocation7] sm:$0xff]  ;;  %v316_v50 = vld [vmem:[#allocation7 + $0x8] sm:$0xff]  ;;  %vm383_vm4 = vcmask 261120   ;;  %s1055_s18 = smov [#allocation19]  }
  0x81   :  { %s664_s19 = sshll.u32 %s1055_s18, 4  ;;  %s665_s19 = int_to_ptr.vmem [resolvable:$true] %s664_s19 }
  0x82   :  { %s1005_s20 = scalar_lea.vmem %s665_s19, 256  ;;  %p1010_p9 = scmp.lt.s32.totalorder %s665_s19, %s665_s19 }
  0x83   :  { %179 = vadd.xlane.f32.xlu0 %v178_v3  ;;  %p1006_p8 = scmp.ne.s32.totalorder %s665_s19, %s1005_s20  ;;  %p1011_p10 = scmp.lt.s32.totalorder %s1005_s20, %s1005_s20 }
  0x85   :  { %p1012_p11 = por %p1011_p10, %p1010_p9 }
  0x87   :  { %p1013_p12 = pnand %p1012_p11, %p1006_p8 }
 0x108   :  { %v177_v4 = vpop.xlane.xlu0 %176 }
 0x109   :  { %v182_v5 = vmul.f32 0.0625, %v177_v4 }
 0x10b   :  { %v184_v6 = vsub.f32 %v1160_v0, %v182_v5 }
 0x10c   :  { %v180_v7 = vpop.xlane.xlu0 %179 }
 0x10d   :  { %v183_v8 = vmul.f32 0.0625, %v180_v7  ;;  %v186_v9 = vmul.f32 %v184_v6, %v184_v6 }
 0x10f   :  { %v185_v10 = vsub.f32 %v1162_v1, %v183_v8  ;;  %v188_v11 = vsel %vm174_vm0, %v186_v9, 0.0 }
 0x110   :  { %189 = vadd.xlane.f32.xlu1 %v188_v11 }
 0x111   :  { %v187_v12 = vmul.f32 %v185_v10, %v185_v10 }
 0x113   :  { %v191_v13 = vsel %vm174_vm0, %v187_v12, 0.0 }
 0x114   :  { %192 = vadd.xlane.f32.xlu1 %v191_v13 }
 0x199   :  { %v190_v15 = vpop.xlane.xlu1 %189 }
 0x19a   :  { %v194_v16 = vmul.f32 0.0625, %v190_v15  ;;  %v778_v15 = vld [vmem:[%s1243_s9 + $0x8] sm:$0xff]  }
 0x19c   :  { %v196_v17 = vadd.f32 1e-05, %v194_v16  ;;  %v779_v16 = vld [vmem:[%s1243_s9] sm:$0xff]  }
 0x19d   :  { %v193_v18 = vpop.xlane.xlu1 %192 }
 0x19e   :  { %781 = vrsqrt.f32 %v196_v17  ;;  %v195_v19 = vmul.f32 0.0625, %v193_v18 }
 0x1a0   :  { %v197_v20 = vadd.f32 1e-05, %v195_v19 }
 0x1a2   :  { %783 = vrsqrt.f32 %v197_v20 }
 0x1ab   :  { %v782_v21 = vpop.eup %781 }
 0x1ac   :  { %v200_v22 = vmul.f32 %v782_v21, %v184_v6 }
 0x1ae   :  { %v208_v26 = vmul.f32 %v681_v23, %v200_v22 }
 0x1af   :  { %v784_v24 = vpop.eup %783 }
 0x1b0   :  { %v201_v25 = vmul.f32 %v784_v24, %v185_v10  ;;  %v216_v29 = vadd.f32 %v682_v27, %v208_v26 }
 0x1b2   :  { %v209_v28 = vmul.f32 %v681_v23, %v201_v25  ;;  %v689_v25 = vld [vmem:[#allocation14] ss:$0 sm:$0xff] }
 0x1b4   :  { %v217_v30 = vadd.f32 %v682_v27, %v209_v28 }
 0x1b6   :  { %v218_v31 = vpack.c.bf16 %v217_v30, %v216_v29  ;;  %v690_v29 = vld [vmem:[#allocation16] ss:$0 sm:$0xff] }
 0x1b8   :  { %v225_v32 = vsel %vm223_vm2, %v218_v31, 0  ;;  %v268_v33 = vrot.slane %v218_v31, 4 }
 0x1b9   :  { %717 = vmatpush3.bf16.msra.mxu0 %v225_v32 }
 0x1ba   :  { %v270_v35 = vsel %vm223_vm2, %v268_v33, 0  ;;  %728 = vmatprep.subr.bf16.mxu0 %v1053_v14 }
 0x1bb   :  { %723 = vmatpush3.bf16.msra.mxu1 %v270_v35 }
 0x1bc   :  { %719 = vmatmul.mubr.msk.bf16.vlgmr.msra.gmra.mxu0 %vm219_vm3, %v1179_v34  ;;  %734 = vmatprep.subr.bf16.mxu1 %v1053_v14 }
 0x1bd   :  { %730 = vmatprep.mubr.msk.bf16.mxu0 %vm1054_vm1, %v1053_v14  ;;  %729 = vmatpush3.bf16.msra.mxu0 %v777_v36 }
 0x1be   :  { %725 = vmatmul.mubr.msk.bf16.vlgmr.msra.gmra.mxu1 %vm219_vm3, %v1179_v34  ;;  %742 = vmatprep.subr.bf16.mxu0 %v1053_v14 }
 0x1bf   :  { %738 = vmatprep.mubr.msk.bf16.mxu1 %vm1054_vm1, %v1053_v14  ;;  %735 = vmatpush3.bf16.msra.mxu1 %v778_v15 }
 0x1c0   :  { %736 = vmatprep.subr.bf16.mxu1 %v1053_v14 }
 0x1c3   :  { %737 = vmatpush3.bf16.msra.mxu1 %v779_v16 }
 0x1c4   :  { %748 = vmatprep.subr.bf16.mxu1 %v1053_v14 }
 0x27c   :  { %v261_v37 = vpop.f32.mrf.mxu0 }
 0x27e   :  { %v720_v38 = vpop.f32.mrf.mxu0  ;;  %v306_v39 = vpop.f32.mrf.mxu1 }
 0x27f   :  { %v312_v40 = vpack.c.bf16 %v306_v39, %v261_v37 }
 0x280   :  { %v264_v41 = vpop.f32.mrf.mxu0  ;;  %v726_v42 = vpop.f32.mrf.mxu1 }
 0x281   :  { %731 = vmatmul.mubr.msk.bf16.vlgmr.msra.gmra.mxu0 %vm174_vm0, %v312_v40  ;;  %v780_v42 = vld [vmem:[#allocation17] sm:$0xff]  }
 0x282   :  { %v721_v43 = vpop.f32.mrf.mxu0  ;;  %v309_v44 = vpop.f32.mrf.mxu1  ;;  %744 = vmatprep.mubr.msk.bf16.mxu0 %vm1054_vm1, %v1053_v14 }
 0x283   :  { %v595_v44 = vpack.c.bf16 %v1162_v1, %v1160_v0 }
 0x284   :  { %v727_v45 = vpop.f32.mrf.mxu1 }
 0x285   :  { %v577_v45 = vld [vmem:[#allocation8] sm:$0xff] }
 0x341   :  { %v360_v47 = vpop.f32.mrf.mxu0 }
 0x342   :  { %v361_v48 = vadd.f32 %v360_v47, %v315_v46  ;;  %v578_v47 = vld [vmem:[#allocation8 + $0x8] sm:$0xff] }
 0x343   :  { %v732_v49 = vpop.f32.mrf.mxu0 }
 0x344   :  { %v687_v51 = vmul.f32 -1.442695, %v361_v48 }
 0x345   :  { %v363_v52 = vpop.f32.mrf.mxu0 }
 0x346   :  { %785 = vpow2.f32 %v687_v51  ;;  %v364_v53 = vadd.f32 %v363_v52, %v316_v50 }
 0x347   :  { %v733_v54 = vpop.f32.mrf.mxu0 }
 0x348   :  { %v688_v55 = vmul.f32 -1.442695, %v364_v53 }
 0x34a   :  { %787 = vpow2.f32 %v688_v55 }
 0x353   :  { %v786_v56 = vpop.eup %785 }
 0x354   :  { %v373_v57 = vadd.f32 1.0, %v786_v56 }
 0x356   :  { %789 = vrcp.f32 %v373_v57 }
 0x357   :  { %v788_v58 = vpop.eup %787 }
 0x358   :  { %v374_v59 = vadd.f32 1.0, %v788_v58 }
 0x35a   :  { %791 = vrcp.f32 %v374_v59 }
 0x363   :  { %v790_v60 = vpop.eup %789 }
 0x364   :  { %v379_v61 = vmul.f32 %v790_v60, %v361_v48 }
 0x366   :  { %v384_v62 = vsel %vm383_vm4, %v379_v61, 0.0 }
 0x367   :  { %v792_v63 = vpop.eup %791  ;;  %385 = vadd.xlane.f32.xlu0 %v384_v62 }
 0x368   :  { %v380_v2 = vmul.f32 %v792_v63, %v364_v53  ;;  %v698_v63 = vld [vmem:[%s1245_s11] ss:$0 sm:$0xff] }
 0x36a   :  { %v387_v3 = vsel %vm383_vm4, %v380_v2, 0.0 }
 0x36b   :  { %388 = vadd.xlane.f32.xlu1 %v387_v3 }
 0x3f0   :  { %v386_v4 = vpop.xlane.xlu0 %385 }
 0x3f1   :  { %v391_v5 = vmul.f32 0.03125, %v386_v4 }
 0x3f3   :  { %v393_v6 = vsub.f32 %v379_v61, %v391_v5 }
 0x3f4   :  { %v389_v7 = vpop.xlane.xlu1 %388 }
 0x3f5   :  { %v392_v8 = vmul.f32 0.03125, %v389_v7  ;;  %v395_v9 = vmul.f32 %v393_v6, %v393_v6 }
 0x3f7   :  { %v394_v10 = vsub.f32 %v380_v2, %v392_v8  ;;  %v397_v11 = vsel %vm383_vm4, %v395_v9, 0.0 }
 0x3f8   :  { %398 = vadd.xlane.f32.xlu0 %v397_v11 }
 0x3f9   :  { %v396_v12 = vmul.f32 %v394_v10, %v394_v10 }
 0x3fb   :  { %v400_v13 = vsel %vm383_vm4, %v396_v12, 0.0 }
 0x3fc   :  { %401 = vadd.xlane.f32.xlu1 %v400_v13 }
 0x481   :  { %v399_v17 = vpop.xlane.xlu0 %398 }
 0x482   :  { %v403_v18 = vmul.f32 0.03125, %v399_v17 }
 0x484   :  { %v405_v19 = vadd.f32 1e-05, %v403_v18 }
 0x485   :  { %v402_v20 = vpop.xlane.xlu1 %401 }
 0x486   :  { %793 = vrsqrt.f32 %v405_v19  ;;  %v404_v21 = vmul.f32 0.03125, %v402_v20 }
 0x488   :  { %v406_v22 = vadd.f32 1e-05, %v404_v21 }
 0x48a   :  { %795 = vrsqrt.f32 %v406_v22 }
 0x493   :  { %v794_v23 = vpop.eup %793 }
 0x494   :  { %v409_v24 = vmul.f32 %v794_v23, %v393_v6 }
 0x496   :  { %v417_v28 = vmul.f32 %v689_v25, %v409_v24 }
 0x497   :  { %v796_v26 = vpop.eup %795 }
 0x498   :  { %v410_v27 = vmul.f32 %v796_v26, %v394_v10  ;;  %v425_v31 = vadd.f32 %v690_v29, %v417_v28 }
 0x49a   :  { %v418_v30 = vmul.f32 %v689_v25, %v410_v27 }
 0x49c   :  { %v426_v32 = vadd.f32 %v690_v29, %v418_v30 }
 0x49e   :  { %v427_v33 = vpack.c.bf16 %v426_v32, %v425_v31 }
 0x4a0   :  { %739 = vmatmul.mubr.msk.bf16.vlgmr.msra.gmra.mxu1 %vm383_vm4, %v427_v33 }
 0x4a1   :  { %750 = vmatprep.mubr.msk.bf16.mxu1 %vm1054_vm1, %v1053_v14 }
 0x560   :  { %v481_v35 = vpop.f32.mrf.mxu1 }
 0x562   :  { %v740_v36 = vpop.f32.mrf.mxu1 }
 0x564   :  { %v484_v37 = vpop.f32.mrf.mxu1 }
 0x565   :  { %v488_v38 = vpack.c.bf16 %v484_v37, %v481_v35 }
 0x566   :  { %v741_v39 = vpop.f32.mrf.mxu1 }
 0x567   :  { %v490_v40 = vsel %vm223_vm2, %v488_v38, 0  ;;  %v533_v41 = vrot.slane %v488_v38, 4 }
 0x568   :  { %743 = vmatpush3.bf16.msra.mxu0 %v490_v40 }
 0x569   :  { %v535_v43 = vsel %vm223_vm2, %v533_v41, 0  ;;  %754 = vmatprep.subr.bf16.mxu0 %v1053_v14 }
 0x56a   :  { %749 = vmatpush3.bf16.msra.mxu1 %v535_v43 }
 0x56b   :  { %745 = vmatmul.mubr.msk.bf16.vlgmr.msra.gmra.mxu0 %vm219_vm3, %v1179_v34 }
 0x56c   :  { %755 = vmatpush3.bf16.msra.mxu0 %v780_v42  ;;  %756 = vmatprep.mubr.msk.bf16.mxu0 %vm1054_vm1, %v1053_v14 }
 0x56d   :  { %751 = vmatmul.mubr.msk.bf16.vlgmr.msra.gmra.mxu1 %vm219_vm3, %v1179_v34 }
 0x573   :  { %757 = vmatmul.mubr.msk.bf16.vlgmr.msra.gmra.mxu0 %vm174_vm0, %v595_v44 }
 0x62b   :  { %v526_v46 = vpop.f32.mrf.mxu0 }
 0x62c   :  { %v579_v48 = vadd.f32 %v577_v45, %v526_v46 }
 0x62d   :  { %v571_v49 = vpop.f32.mrf.mxu1  ;;  %v746_v50 = vpop.f32.mrf.mxu0 }
 0x62e   :  { %v696_v51 = vmul.f32 -1.442695, %v579_v48  ;;  %v580_v52 = vadd.f32 %v578_v47, %v571_v49 }
 0x62f   :  { %v752_v53 = vpop.f32.mrf.mxu1  ;;  %v529_v54 = vpop.f32.mrf.mxu0 }
 0x630   :  { %797 = vpow2.f32 %v696_v51  ;;  %v697_v14 = vmul.f32 -1.442695, %v580_v52 }
 0x631   :  { %v574_v55 = vpop.f32.mrf.mxu1  ;;  %v747_v56 = vpop.f32.mrf.mxu0 }
 0x632   :  { %799 = vpow2.f32 %v697_v14 }
 0x633   :  { %v753_v34 = vpop.f32.mrf.mxu1  ;;  %v648_v57 = vpop.f32.mrf.mxu0 }
 0x634   :  { %v649_v4 = vadd.f32 %v698_v63, %v648_v57 }
 0x635   :  { %v758_v0 = vpop.f32.mrf.mxu0 }
 0x637   :  { %v651_v1 = vpop.f32.mrf.mxu0 }
 0x638   :  { %v652_v8 = vadd.f32 %v698_v63, %v651_v1 }
 0x639   :  { %v759_v58 = vpop.f32.mrf.mxu0 }
 0x63d   :  { %v798_v59 = vpop.eup %797 }
 0x63e   :  { %v587_v60 = vadd.f32 1.0, %v798_v59 }
 0x63f   :  { %v800_v61 = vpop.eup %799 }
 0x640   :  { %801 = vrcp.f32 %v587_v60  ;;  %v588_v62 = vadd.f32 1.0, %v800_v61 }
 0x642   :  { %803 = vrcp.f32 %v588_v62 }
 0x64d   :  { %v802_v2 = vpop.eup %801 }
 0x64e   :  { %v593_v3 = vmul.f32 %v802_v2, %v579_v48 }
 0x64f   :  { %v804_v5 = vpop.eup %803 }
 0x650   :  { %v594_v6 = vmul.f32 %v804_v5, %v580_v52  ;;  %v655_v7 = vadd.f32 %v649_v4, %v593_v3 }
 0x652   :  { %657 = vst.msk [vmem:[#allocation19] sm:$0xff] %vm383_vm4, %v655_v7  ;;  %v656_v9 = vadd.f32 %v652_v8, %v594_v6 }
 0x654   :  { %658 = vst.msk [vmem:[#allocation19 + $0x8] sm:$0xff] %vm383_vm4, %v656_v9 }
 0x655   :  { %1016 = shalt.err (!%p1013_p12)
}
 0x656   :  { %670 = dma.vmem_to_hbm [thread:$0]  %s665_s19, 256, %s1246_s12, [#allocation4], %s1042_s13, %s1042_s13, %s1043_s14  }
 0x657   :  { %1037 = dma.done.wait [#allocation4], 256  }
 0x658   :  { %1038 = vsyncadd [#allocation4], 4294967040 }
 0x659   :  { %674 = vsyncpa [#allocation3], 1 }
 0x65a   :  { %675 = vsyncpa [#allocation6], 1 }
 0x65b   :  { %676 = vsyncpa [#allocation9], 1 }
 0x65c   :  { %677 = vsyncpa [#allocation12], 1 }
 0x65d   :  { %678 = vsyncpa [#allocation15], 1 }
 0x65e   :  { %679 = vsyncpa [#allocation18], 1 }
 0x65f   :  { %680 = vsyncpa [#allocation4], 1 }

</bundles_post_ra>
